<compile_context>
chip_gen: v6e
topology: v6e:2x2x1
jax: 0.10.0
libtpu: 0.0.40
codegen_flags: <defaults>
</compile_context>

<pallas_src>
import jax
import jax.numpy as jnp
from jax.experimental import pallas as pl
from jax.experimental.pallas import tpu as pltpu

LANE = 128      # TPU vreg lane width (fast / last dim)
SUBLANE = 8     # f32 sublane count (second-minor dim)
OUT_PAD = 16    # narrow lane pad for the 10-wide output (masked store)


def _round_up(x, m):
    return (x + m - 1) // m * m


def q_mlp_kernel(x_ref, w1_ref, b1_ref, w2_ref, b2_ref, out_ref):
    """Fused  out = relu(x @ w1 + b1) @ w2 + b2  on one batch tile."""
    # x_ref: (TB, D) input dtype  w1_ref: (D, Hp)  b1_ref: (1, Hp) f32
    # w2_ref: (Hp, Op)            b2_ref: (1, Op) f32   out_ref: (TB, Op)
    x = x_ref[...].astype(w1_ref.dtype)           # in-VMEM cast (bf16 feed if enabled)
    h = jnp.dot(x, w1_ref[...], preferred_element_type=jnp.float32)
    h = jnp.maximum(h + b1_ref[...], 0.0)         # bias + ReLU in f32
    h = h.astype(w2_ref.dtype)
    o = jnp.dot(h, w2_ref[...], preferred_element_type=jnp.float32)
    out_ref[...] = (o + b2_ref[...]).astype(out_ref.dtype)


def _vmem_budget_bytes():
    """Usable VMEM budget (with headroom) for tile sizing / vmem_limit_bytes."""
    cap = 64 << 20                                # conservative default: v7x physical VMEM/TC
    try:
        cap = int(pltpu.get_tpu_info().vmem_capacity_bytes)
    except Exception:
        pass                                      # non-queryable -> stay conservative
    # 3/4 of physical, capped, leaves room for Mosaic-internal scratch.
    return int(min(cap * 3 // 4, 100 << 20))


def q_forward(x_nchw, w1, b1, w2, b2, *, batch_tile=None, use_bf16=False,
              small_batch_max=256, out_dtype=jnp.float32):
    """Pallas equivalent of Q.forward. x_nchw: (B, feature_size*8, 4, 4)."""
    f32 = jnp.float32
    B = x_nchw.shape[0]
    x_flat = x_nchw.reshape(B, -1)                # contiguous view: no HBM pass
    D = x_flat.shape[1]
    H = w1.shape[1]                               # 100
    O = w2.shape[1]                               # 10

    # ---- pad hidden to lane width, output only to 16 (done once; tiny) -----
    # Zero padding is exact: relu(0)=0 and padded rows/cols of w2/b2 are zero.
    Hp = _round_up(H, LANE)
    Op = _round_up(O, OUT_PAD)
    w_dtype = jnp.bfloat16 if use_bf16 else f32
    w1p = jnp.zeros((D, Hp), f32).at[:, :H].set(w1.astype(f32)).astype(w_dtype)
    b1p = jnp.zeros((1, Hp), f32).at[:, :H].set(b1.reshape(1, H).astype(f32))
    w2p = jnp.zeros((Hp, Op), f32).at[:H, :O].set(w2.astype(f32)).astype(w_dtype)
    b2p = jnp.zeros((1, Op), f32).at[:, :O].set(b2.reshape(1, O).astype(f32))

    x_bytes = jnp.dtype(x_flat.dtype).itemsize    # x is NOT cast in the wrapper
    w_bytes = jnp.dtype(w_dtype).itemsize
    budget = _vmem_budget_bytes()
    weights_vmem = 2 * ((D * Hp + Hp * Op) * w_bytes + (Hp + Op) * 4)  # conservative (2x buffered)

    flops = 2 * B * D * Hp + 2 * B * Hp * Op
    bytes_accessed = (B * D * x_bytes + B * Op * jnp.dtype(out_dtype).itemsize
                      + (D * Hp + Hp * Op) * w_bytes + (Hp + Op) * 4)
    cost = pl.CostEstimate(flops=int(flops), transcendentals=0,
                           bytes_accessed=int(bytes_accessed))

    grid_free_need = (B * D * x_bytes + B * Op * 4
                      + (D * Hp + Hp * Op) * w_bytes + (Hp + Op) * 4 + (2 << 20))

    if B <= small_batch_max and grid_free_need <= budget:
        # ---- tiny batch: single invocation, whole arrays as VMEM blocks -----
        vmem = pl.BlockSpec(memory_space=pltpu.MemorySpace.VMEM)
        out_p = pl.pallas_call(
            q_mlp_kernel,
            out_shape=jax.ShapeDtypeStruct((B, Op), out_dtype),
            in_specs=[vmem] * 5,
            out_specs=vmem,
            cost_estimate=cost,
            compiler_params=pltpu.CompilerParams(vmem_limit_bytes=budget),
        )(x_flat, w1p, b1p, w2p, b2p)
    else:
        # ---- stream batch tiles; weights VMEM-resident (constant block idx) --
        sub = 16 if (use_bf16 or x_bytes < 4) else SUBLANE
        per_row = 2 * (D * x_bytes + Op * 4)      # double-buffered x tile + out tile
        avail = max(budget - weights_vmem - (2 << 20), per_row * sub)
        tb = max(sub, (avail // per_row) // sub * sub)
        if batch_tile is not None:
            tb = min(tb, _round_up(batch_tile, sub))
        tb = int(min(tb, 2048))
        if pl.cdiv(B, tb) < 2:                    # >=2 tiles so v7x's 2 TCs both work
            tb = max(sub, _round_up(pl.cdiv(B, 2), sub))
        grid = (pl.cdiv(B, tb),)                  # ragged last tile: no padding pass
        out_p = pl.pallas_call(
            q_mlp_kernel,
            out_shape=jax.ShapeDtypeStruct((B, Op), out_dtype),
            grid=grid,
            in_specs=[
                pl.BlockSpec((tb, D), lambda i: (i, 0)),    # x: streamed
                pl.BlockSpec((D, Hp), lambda i: (0, 0)),    # weights: resident
                pl.BlockSpec((1, Hp), lambda i: (0, 0)),
                pl.BlockSpec((Hp, Op), lambda i: (0, 0)),
                pl.BlockSpec((1, Op), lambda i: (0, 0)),
            ],
            out_specs=pl.BlockSpec((tb, Op), lambda i: (i, 0)),
            cost_estimate=cost,
            compiler_params=pltpu.CompilerParams(
                dimension_semantics=("parallel",),          # v7x: 2 TCs share B
                vmem_limit_bytes=budget),
        )(x_flat, w1p, b1p, w2p, b2p)

    out = out_p[:, :O]          # tiny (B,16)->(B,10); fuses into consumer under jit
    return jnp.squeeze(out)     # matches torch .squeeze()


def init_params(feature_size, key):
    """Deterministic init mimicking nn.Linear defaults (U(-1/sqrt(fan_in), +))."""
    D = feature_size * 8 * 4 * 4
    H, O = 100, 10
    k1, k2, k3, k4 = jax.random.split(key, 4)
    bnd1 = 1.0 / jnp.sqrt(D)
    bnd2 = 1.0 / jnp.sqrt(H)
    w1 = jax.random.uniform(k1, (D, H), jnp.float32, -bnd1, bnd1)
    b1 = jax.random.uniform(k2, (H,), jnp.float32, -bnd1, bnd1)
    w2 = jax.random.uniform(k3, (H, O), jnp.float32, -bnd2, bnd2)
    b2 = jax.random.uniform(k4, (O,), jnp.float32, -bnd2, bnd2)
    return w1, b1, w2, b2


if __name__ == "__main__":
    feature_size = 4                     # -> D = 4*8*4*4 = 512
    key = jax.random.PRNGKey(0)
    kx, kp, kx2 = jax.random.split(key, 3)
    w1, b1, w2, b2 = init_params(feature_size, kp)

    def ref_fwd(x):
        xf = x.reshape(x.shape[0], -1)
        return jnp.squeeze(jnp.maximum(xf @ w1 + b1, 0.0) @ w2 + b2)

    # --- tiny batch: grid-free single-block path -----------------------------
    B = 2
    x = jax.random.normal(kx, (B, feature_size * 8, 4, 4), jnp.float32)
    out = jax.block_until_ready(q_forward(x, w1, b1, w2, b2))
    assert out.shape == (B, 10)
    assert jnp.allclose(out, ref_fwd(x), atol=1e-4, rtol=1e-4)

    # --- gridded streaming path with a RAGGED last tile (B=20, TB=8 -> grid 3)
    B2 = 20
    x2 = jax.random.normal(kx2, (B2, feature_size * 8, 4, 4), jnp.float32)
    out2 = jax.block_until_ready(
        q_forward(x2, w1, b1, w2, b2, batch_tile=8, small_batch_max=0))
    assert out2.shape == (B2, 10)
    assert jnp.allclose(out2, ref_fwd(x2), atol=1e-4, rtol=1e-4)

    # --- bf16 MXU-feed variant (in-kernel cast, f32 accumulation), gridded ---
    out3 = jax.block_until_ready(
        q_forward(x2, w1, b1, w2, b2, batch_tile=8, small_batch_max=0,
                  use_bf16=True))
    assert out3.shape == (B2, 10)
    assert jnp.allclose(out3, ref_fwd(x2), atol=5e-2, rtol=5e-2)

    print("KERNEL_OK")
</pallas_src>

<mosaic_0001>
module attributes {stable_mosaic.version = 11 : i64} {
  func.func @q_mlp_kernel(%arg0: memref<2x512xf32, #tpu.memory_space<vmem>>, %arg1: memref<512x128xf32, #tpu.memory_space<vmem>>, %arg2: memref<1x128xf32, #tpu.memory_space<vmem>>, %arg3: memref<128x16xf32, #tpu.memory_space<vmem>>, %arg4: memref<1x16xf32, #tpu.memory_space<vmem>>, %arg5: memref<2x16xf32, #tpu.memory_space<vmem>>) attributes {dimension_semantics = [], scalar_prefetch = 0 : i64, scratch_operands = 0 : i64, tpu.core_type = #tpu.core_type<tc>} {
    %c0 = arith.constant 0 : index
    %c0_0 = arith.constant 0 : index
    %0 = vector.load %arg0[%c0, %c0_0] : memref<2x512xf32, #tpu.memory_space<vmem>>, vector<2x512xf32>
    %c0_1 = arith.constant 0 : index
    %c0_2 = arith.constant 0 : index
    %1 = vector.load %arg1[%c0_1, %c0_2] : memref<512x128xf32, #tpu.memory_space<vmem>>, vector<512x128xf32>
    %cst = arith.constant dense<0.000000e+00> : vector<2x128xf32>
    %2 = tpu.matmul %0, %1, %cst {dimension_numbers = #tpu.dot_dimension_numbers<[1], [0], [0], [1], [0, 0, 1, 1], [], []>} : vector<2x512xf32>, vector<512x128xf32>, vector<2x128xf32> -> vector<2x128xf32>
    %c0_3 = arith.constant 0 : index
    %c0_4 = arith.constant 0 : index
    %3 = vector.load %arg2[%c0_3, %c0_4] : memref<1x128xf32, #tpu.memory_space<vmem>>, vector<1x128xf32>
    %4 = vector.broadcast %3 : vector<1x128xf32> to vector<2x128xf32>
    %5 = arith.addf %2, %4 : vector<2x128xf32>
    %cst_5 = arith.constant 0.000000e+00 : f32
    %6 = vector.broadcast %cst_5 : f32 to vector<2x128xf32>
    %7 = arith.maximumf %5, %6 : vector<2x128xf32>
    %c0_6 = arith.constant 0 : index
    %c0_7 = arith.constant 0 : index
    %8 = vector.load %arg3[%c0_6, %c0_7] : memref<128x16xf32, #tpu.memory_space<vmem>>, vector<128x16xf32>
    %cst_8 = arith.constant dense<0.000000e+00> : vector<2x16xf32>
    %9 = tpu.matmul %7, %8, %cst_8 {dimension_numbers = #tpu.dot_dimension_numbers<[1], [0], [0], [1], [0, 0, 1, 1], [], []>} : vector<2x128xf32>, vector<128x16xf32>, vector<2x16xf32> -> vector<2x16xf32>
    %c0_9 = arith.constant 0 : index
    %c0_10 = arith.constant 0 : index
    %10 = vector.load %arg4[%c0_9, %c0_10] : memref<1x16xf32, #tpu.memory_space<vmem>>, vector<1x16xf32>
    %11 = vector.broadcast %10 : vector<1x16xf32> to vector<2x16xf32>
    %12 = arith.addf %9, %11 : vector<2x16xf32>
    %c0_11 = arith.constant 0 : index
    %c0_12 = arith.constant 0 : index
    %13 = vector.load %arg5[%c0_11, %c0_12] : memref<2x16xf32, #tpu.memory_space<vmem>>, vector<2x16xf32>
    tpu.vector_store %arg5[%c0_11, %c0_12], %12 {strides = array<i32>} : memref<2x16xf32, #tpu.memory_space<vmem>>, vector<2x16xf32>,
    return
  }
}

</mosaic_0001>

<bundles_post_ra>
// kernel: tpu_custom_call.1
= control target key start
LH: loop header
LB: loop body
LE: loop exit
PB: predicated region body
PF: predicated region fallthrough
CT: control target
= control target key end

     0   :  { %10 = vsyncpa [#allocation3], 0  ;;  %s656_s0 = inlined_call_operand.vmem [shape: f32[2,512], index: 0, kind: input, shape index: {}]   ;;  %s657_s1 = inlined_call_operand.hbm [shape: f32[512,128], index: 1, kind: input, shape index: {}]   ;;  %s658_s2 = inlined_call_operand.vmem [shape: f32[1,128], index: 2, kind: input, shape index: {}]   ;;  %s659_s3 = inlined_call_operand.vmem [shape: f32[128,16], index: 3, kind: input, shape index: {}]   ;;  %s660_s4 = inlined_call_operand.vmem [shape: f32[1,16], index: 4, kind: input, shape index: {}]   ;;  %s661_s5 = inlined_call_operand.hbm [shape: f32[2,16], index: 5, kind: output, shape index: {}]  }
   0x1   :  { %11 = vsyncpa [#allocation4], 0  ;;  %s556_s18 = smov [#allocation2]  }
   0x2   :  { %s19_s19 = sshll.u32 %s556_s18, 4  ;;  %s20_s19 = int_to_ptr.vmem [resolvable:$true] %s19_s19 }
   0x3   :  { %s520_s20 = scalar_lea.vmem %s20_s19, 8192  ;;  %p525_p1 = scmp.lt.s32.totalorder %s20_s19, %s20_s19 }
   0x4   :  { %p521_p0 = scmp.ne.s32.totalorder %s20_s19, %s520_s20  ;;  %p526_p2 = scmp.lt.s32.totalorder %s520_s20, %s520_s20 }
   0x6   :  { %p527_p3 = por %p526_p2, %p525_p1 }
   0x8   :  { %p528_p4 = pnand %p527_p3, %p521_p0 }
   0xa   :  { %531 = shalt.err (!%p528_p4)
}
   0xb   :  { %s557_s21 = smov 128   ;;  %s558_s22 = smov 8  }
   0xc   :  { %25 = dma.hbm_to_vmem [thread:$0]  %s657_s1, 8192, %s20_s19, [#allocation3], %s557_s21, %s557_s21, %s558_s22  }
   0xd   :  { %552 = dma.done.wait [#allocation3], 8192  }
   0xe   :  { %553 = vsyncadd [#allocation3], 4294959104  ;;  %v67_v0 = vld [vmem:[#allocation2 + $0xf8] sm:$0xff]  ;;  %v66_v4 = vld [vmem:[#allocation2 + $0xf0] sm:$0xff]  ;;  %v559_v30 = vmov 1983009808   ;;  %v112_v32 = vlaneseq }
   0xf   :  { %v99_v1 = vld [vmem:[#allocation2 + $0x1f8] sm:$0xff]  ;;  %382 = vmatprep.subr.mxu0 %v67_v0  ;;  %v98_v5 = vld [vmem:[#allocation2 + $0x1f0] sm:$0xff]  ;;  %v65_v8 = vld [vmem:[#allocation2 + $0xe8] sm:$0xff]  ;;  %v110_v31 = vunpack.c.l.s4 %v559_v30  ;;  %vm561_vm0 = vmmov 0   ;;  %vm363_vm1 = vcmask 123904  }
  0x10   :  { %v51_v2 = vld [vmem:[#allocation2 + $0x78] sm:$0xff]  ;;  %417 = vmatprep.subr.mxu1 %v99_v1  ;;  %v50_v6 = vld [vmem:[#allocation2 + $0x70] sm:$0xff]  ;;  %v97_v9 = vld [vmem:[#allocation2 + $0x1e8] sm:$0xff]  ;;  %v113_v42 = vshrl.u32 %v112_v32, 7 }
  0x11   :  { %v83_v3 = vld [vmem:[#allocation2 + $0x178] sm:$0xff]  ;;  %383 = vmatpush3.msra.mxu0 %v51_v2  ;;  %v82_v7 = vld [vmem:[#allocation2 + $0x170] sm:$0xff]  ;;  %v49_v10 = vld [vmem:[#allocation2 + $0x68] sm:$0xff]  ;;  %v111_v41 = vunpack.c.0.s8 %v110_v31 }
  0x12   :  { %418 = vmatpush3.msra.mxu1 %v83_v3  ;;  %384 = vmatprep.subr.mxu0 %v66_v4  ;;  %v81_v11 = vld [vmem:[#allocation2 + $0x168] sm:$0xff]  ;;  %v64_v12 = vld [vmem:[#allocation2 + $0xe0] sm:$0xff]  ;;  %v63_v16 = vld [vmem:[#allocation2 + $0xd8] sm:$0xff] }
  0x13   :  { %419 = vmatprep.subr.mxu1 %v98_v5  ;;  %385 = vmatpush3.msra.mxu0 %v50_v6  ;;  %v96_v13 = vld [vmem:[#allocation2 + $0x1e0] sm:$0xff]  ;;  %v95_v17 = vld [vmem:[#allocation2 + $0x1d8] sm:$0xff]  ;;  %v62_v20 = vld [vmem:[#allocation2 + $0xd0] sm:$0xff]  ;;  %v114_v51 = vsub.s32 %v111_v41, %v113_v42 }
  0x14   :  { %420 = vmatpush3.msra.mxu1 %v82_v7  ;;  %386 = vmatprep.subr.mxu0 %v65_v8  ;;  %v48_v14 = vld [vmem:[#allocation2 + $0x60] sm:$0xff]  ;;  %v47_v18 = vld [vmem:[#allocation2 + $0x58] sm:$0xff]  ;;  %v94_v21 = vld [vmem:[#allocation2 + $0x1d0] sm:$0xff] }
  0x15   :  { %421 = vmatprep.subr.mxu1 %v97_v9  ;;  %v80_v15 = vld [vmem:[#allocation2 + $0x160] sm:$0xff]  ;;  %387 = vmatpush3.msra.mxu0 %v49_v10  ;;  %v79_v19 = vld [vmem:[#allocation2 + $0x158] sm:$0xff]  ;;  %v46_v22 = vld [vmem:[#allocation2 + $0x50] sm:$0xff] }
  0x16   :  { %422 = vmatpush3.msra.mxu1 %v81_v11  ;;  %388 = vmatprep.subr.mxu0 %v64_v12  ;;  %v78_v23 = vld [vmem:[#allocation2 + $0x150] sm:$0xff]  ;;  %v61_v24 = vld [vmem:[#allocation2 + $0xc8] sm:$0xff]  ;;  %v60_v28 = vld [vmem:[#allocation2 + $0xc0] sm:$0xff] }
  0x17   :  { %423 = vmatprep.subr.mxu1 %v96_v13  ;;  %389 = vmatpush3.msra.mxu0 %v48_v14  ;;  %v93_v25 = vld [vmem:[#allocation2 + $0x1c8] sm:$0xff]  ;;  %v92_v29 = vld [vmem:[#allocation2 + $0x1c0] sm:$0xff]  ;;  %v59_v35 = vld [vmem:[#allocation2 + $0xb8] sm:$0xff]  ;;  %v560_v13 = vmov 0.0  }
  0x18   :  { %424 = vmatpush3.msra.mxu1 %v80_v15  ;;  %390 = vmatprep.subr.mxu0 %v63_v16  ;;  %v45_v26 = vld [vmem:[#allocation2 + $0x48] sm:$0xff]  ;;  %v44_v33 = vld [vmem:[#allocation2 + $0x40] sm:$0xff]  ;;  %v91_v36 = vld [vmem:[#allocation2 + $0x1b8] sm:$0xff] }
  0x19   :  { %425 = vmatprep.subr.mxu1 %v95_v17  ;;  %391 = vmatpush3.msra.mxu0 %v47_v18  ;;  %v77_v27 = vld [vmem:[#allocation2 + $0x148] sm:$0xff]  ;;  %v76_v34 = vld [vmem:[#allocation2 + $0x140] sm:$0xff]  ;;  %v43_v37 = vld [vmem:[#allocation2 + $0x38] sm:$0xff] }
  0x1a   :  { %426 = vmatpush3.msra.mxu1 %v79_v19  ;;  %392 = vmatprep.subr.mxu0 %v62_v20  ;;  %v75_v38 = vld [vmem:[#allocation2 + $0x138] sm:$0xff]  ;;  %v58_v39 = vld [vmem:[#allocation2 + $0xb0] sm:$0xff]  ;;  %v57_v45 = vld [vmem:[#allocation2 + $0xa8] sm:$0xff] }
  0x1b   :  { %427 = vmatprep.subr.mxu1 %v94_v21  ;;  %393 = vmatpush3.msra.mxu0 %v46_v22  ;;  %v90_v40 = vld [vmem:[#allocation2 + $0x1b0] sm:$0xff]  ;;  %v89_v46 = vld [vmem:[#allocation2 + $0x1a8] sm:$0xff]  ;;  %v56_v49 = vld [vmem:[#allocation2 + $0xa0] sm:$0xff] }
  0x1c   :  { %428 = vmatpush3.msra.mxu1 %v78_v23  ;;  %394 = vmatprep.subr.mxu0 %v61_v24  ;;  %v42_v43 = vld [vmem:[#allocation2 + $0x30] sm:$0xff]  ;;  %v41_v47 = vld [vmem:[#allocation2 + $0x28] sm:$0xff]  ;;  %v88_v50 = vld [vmem:[#allocation2 + $0x1a0] sm:$0xff] }
  0x1d   :  { %429 = vmatprep.subr.mxu1 %v93_v25  ;;  %395 = vmatpush3.msra.mxu0 %v45_v26  ;;  %v74_v44 = vld [vmem:[#allocation2 + $0x130] sm:$0xff]  ;;  %v73_v48 = vld [vmem:[#allocation2 + $0x128] sm:$0xff]  ;;  %v40_v52 = vld [vmem:[#allocation2 + $0x20] sm:$0xff] }
  0x1e   :  { %430 = vmatpush3.msra.mxu1 %v77_v27  ;;  %396 = vmatprep.subr.mxu0 %v60_v28  ;;  %v72_v53 = vld [vmem:[#allocation2 + $0x120] sm:$0xff]  ;;  %v55_v55 = vld [vmem:[#allocation2 + $0x98] sm:$0xff]  ;;  %v54_v60 = vld [vmem:[#allocation2 + $0x90] sm:$0xff] }
  0x1f   :  { %431 = vmatprep.subr.mxu1 %v92_v29  ;;  %397 = vmatpush3.msra.mxu0 %v44_v33  ;;  %v35_v54 = vld [vmem:[%s656_s0] sm:$0xff]  ;;  %v87_v56 = vld [vmem:[#allocation2 + $0x198] sm:$0xff]  ;;  %v86_v61 = vld [vmem:[#allocation2 + $0x190] sm:$0xff] }
  0x20   :  { %432 = vmatpush3.msra.mxu1 %v76_v34  ;;  %398 = vmatprep.subr.mxu0 %v59_v35  ;;  %v108_v57 = vcombine.high %v35_v54, %v35_v54  ;;  %v39_v58 = vld [vmem:[#allocation2 + $0x18] sm:$0xff]  ;;  %v115_v62 = vrot.slane %v35_v54, %v114_v51  ;;  %v38_v63 = vld [vmem:[#allocation2 + $0x10] sm:$0xff]  ;;  %v53_v2 = vld [vmem:[#allocation2 + $0x88] sm:$0xff] }
  0x21   :  { %433 = vmatprep.subr.mxu1 %v91_v36  ;;  %399 = vmatpush3.msra.mxu0 %v43_v37  ;;  %v71_v59 = vld [vmem:[#allocation2 + $0x118] sm:$0xff]  ;;  %v70_v0 = vld [vmem:[#allocation2 + $0x110] sm:$0xff]  ;;  %v85_v3 = vld [vmem:[#allocation2 + $0x188] sm:$0xff] }
  0x22   :  { %434 = vmatpush3.msra.mxu1 %v75_v38  ;;  %400 = vmatprep.subr.mxu0 %v58_v39  ;;  %v122_v1 = vrot.slane %v108_v57, %v114_v51  ;;  %v37_v4 = vld [vmem:[#allocation2 + $0x8] sm:$0xff]  ;;  %v52_v6 = vld [vmem:[#allocation2 + $0x80] sm:$0xff]  ;;  %v123_v8 = vcombine.high %v115_v62, %v115_v62  ;;  %v285_v12 = vld [vmem:[%s659_s3 + $0x78] sm:$0xff] }
  0x23   :  { %435 = vmatprep.subr.mxu1 %v90_v40  ;;  %401 = vmatpush3.msra.mxu0 %v42_v43  ;;  %v69_v5 = vld [vmem:[#allocation2 + $0x108] sm:$0xff]  ;;  %v84_v7 = vld [vmem:[#allocation2 + $0x180] sm:$0xff]  ;;  %v284_v14 = vld [vmem:[%s659_s3 + $0x70] sm:$0xff] }
  0x24   :  { %436 = vmatpush3.msra.mxu1 %v74_v44  ;;  %402 = vmatprep.subr.mxu0 %v57_v45  ;;  %v36_v9 = vld [vmem:[#allocation2] sm:$0xff]  ;;  %v124_v10 = vcombine.high %v122_v1, %v122_v1  ;;  %v283_v15 = vld [vmem:[%s659_s3 + $0x68] sm:$0xff]  ;;  %v281_v17 = vld [vmem:[%s659_s3 + $0x58] sm:$0xff] }
  0x25   :  { %437 = vmatprep.subr.mxu1 %v89_v46  ;;  %403 = vmatpush3.msra.mxu0 %v41_v47  ;;  %v68_v11 = vld [vmem:[#allocation2 + $0x100] sm:$0xff]  ;;  %v280_v18 = vld [vmem:[%s659_s3 + $0x50] sm:$0xff]  ;;  %v279_v19 = vld [vmem:[%s659_s3 + $0x48] sm:$0xff] }
  0x26   :  { %438 = vmatpush3.msra.mxu1 %v73_v48  ;;  %404 = vmatprep.subr.mxu0 %v56_v49  ;;  %v282_v16 = vld [vmem:[%s659_s3 + $0x60] sm:$0xff]  ;;  %v277_v21 = vld [vmem:[%s659_s3 + $0x38] sm:$0xff]  ;;  %v276_v22 = vld [vmem:[%s659_s3 + $0x30] sm:$0xff] }
  0x27   :  { %439 = vmatprep.subr.mxu1 %v88_v50  ;;  %405 = vmatpush3.msra.mxu0 %v40_v52  ;;  %v278_v20 = vld [vmem:[%s659_s3 + $0x40] sm:$0xff]  ;;  %v275_v23 = vld [vmem:[%s659_s3 + $0x28] sm:$0xff]  ;;  %v273_v25 = vld [vmem:[%s659_s3 + $0x18] sm:$0xff] }
  0x28   :  { %440 = vmatpush3.msra.mxu1 %v72_v53  ;;  %406 = vmatprep.subr.mxu0 %v55_v55  ;;  %v274_v24 = vld [vmem:[%s659_s3 + $0x20] sm:$0xff]  ;;  %v272_v26 = vld [vmem:[%s659_s3 + $0x10] sm:$0xff]  ;;  %v271_v27 = vld [vmem:[%s659_s3 + $0x8] sm:$0xff] }
  0x29   :  { %441 = vmatprep.subr.mxu1 %v87_v56  ;;  %407 = vmatpush3.msra.mxu0 %v39_v58  ;;  %v270_v28 = vld [vmem:[%s659_s3] sm:$0xff]  ;;  %s562_s3 = smov [#allocation5]  }
  0x2a   :  { %442 = vmatpush3.msra.mxu1 %v71_v59  ;;  %408 = vmatprep.subr.mxu0 %v54_v60  ;;  %v380_v31 = vld [vmem:[%s658_s2] ss:$0 sm:$0xff]  ;;  %s371_s9 = sshll.u32 %s562_s3, 4  ;;  %s372_s9 = int_to_ptr.vmem [resolvable:$true] %s371_s9 }
  0x2b   :  { %443 = vmatprep.subr.mxu1 %v86_v61  ;;  %409 = vmatpush3.msra.mxu0 %v38_v63  ;;  %v381_v39 = vld [vmem:[%s660_s4] ss:$0 sm:$0xff]  ;;  %s532_s2 = scalar_lea.vmem %s372_s9, 32  ;;  %p537_p6 = scmp.lt.s32.totalorder %s372_s9, %s372_s9 }
  0x2c   :  { %444 = vmatpush3.msra.mxu1 %v70_v0  ;;  %410 = vmatprep.subr.mxu0 %v53_v2  ;;  %p533_p5 = scmp.ne.s32.totalorder %s372_s9, %s532_s2  ;;  %p538_p7 = scmp.lt.s32.totalorder %s532_s2, %s532_s2 }
  0x2d   :  { %445 = vmatprep.subr.mxu1 %v85_v3  ;;  %411 = vmatpush3.msra.mxu0 %v37_v4 }
  0x2e   :  { %446 = vmatpush3.msra.mxu1 %v69_v5  ;;  %412 = vmatprep.subr.mxu0 %v52_v6  ;;  %p539_p8 = por %p538_p7, %p537_p6 }
  0x2f   :  { %447 = vmatprep.subr.mxu1 %v84_v7  ;;  %413 = vmatpush3.msra.mxu0 %v36_v9 }
  0x30   :  { %193 = vmatprep.mubr.f32.mxu0 %v123_v8  ;;  %448 = vmatpush3.msra.mxu1 %v68_v11  ;;  %p540_p9 = pnand %p539_p8, %p533_p5 }
  0x31   :  { %263 = vmatprep.mubr.f32.mxu1 %v124_v10  ;;  %194 = vmatmul.mubr.f32.vlgmr.msra.gmra.mxu0 %v115_v62 }
  0x32   :  { %264 = vmatmul.mubr.f32.vlgmr.msra.gmra.mxu1 %v122_v1  ;;  %469 = vmatprep.subr.mxu0 %v560_v13 }
  0x33   :  { %470 = vmatpush3.msra.mxu0 %v285_v12  ;;  %501 = vmatprep.mubr.msk.f32.mxu0 %vm561_vm0, %v560_v13 }
  0x34   :  { %471 = vmatprep.subr.mxu0 %v560_v13 }
  0x35   :  { %472 = vmatpush3.msra.mxu0 %v284_v14 }
  0x36   :  { %473 = vmatprep.subr.mxu0 %v560_v13 }
  0x37   :  { %474 = vmatpush3.msra.mxu0 %v283_v15 }
  0x38   :  { %475 = vmatprep.subr.mxu0 %v560_v13 }
  0x39   :  { %476 = vmatpush3.msra.mxu0 %v282_v16 }
  0x3a   :  { %477 = vmatprep.subr.mxu0 %v560_v13 }
  0x3b   :  { %478 = vmatpush3.msra.mxu0 %v281_v17 }
  0x3c   :  { %479 = vmatprep.subr.mxu0 %v560_v13 }
  0x3d   :  { %480 = vmatpush3.msra.mxu0 %v280_v18 }
  0x3e   :  { %481 = vmatprep.subr.mxu0 %v560_v13 }
  0x3f   :  { %482 = vmatpush3.msra.mxu0 %v279_v19 }
  0x40   :  { %483 = vmatprep.subr.mxu0 %v560_v13 }
  0x41   :  { %484 = vmatpush3.msra.mxu0 %v278_v20 }
  0x42   :  { %485 = vmatprep.subr.mxu0 %v560_v13 }
  0x43   :  { %486 = vmatpush3.msra.mxu0 %v277_v21 }
  0x44   :  { %487 = vmatprep.subr.mxu0 %v560_v13 }
  0x45   :  { %488 = vmatpush3.msra.mxu0 %v276_v22 }
  0x46   :  { %489 = vmatprep.subr.mxu0 %v560_v13 }
  0x47   :  { %490 = vmatpush3.msra.mxu0 %v275_v23 }
  0x48   :  { %491 = vmatprep.subr.mxu0 %v560_v13 }
  0x49   :  { %492 = vmatpush3.msra.mxu0 %v274_v24 }
  0x4a   :  { %493 = vmatprep.subr.mxu0 %v560_v13 }
  0x4b   :  { %494 = vmatpush3.msra.mxu0 %v273_v25 }
  0x4c   :  { %495 = vmatprep.subr.mxu0 %v560_v13 }
  0x4d   :  { %496 = vmatpush3.msra.mxu0 %v272_v26 }
  0x4e   :  { %497 = vmatprep.subr.mxu0 %v560_v13 }
  0x4f   :  { %498 = vmatpush3.msra.mxu0 %v271_v27 }
  0x50   :  { %499 = vmatprep.subr.mxu0 %v560_v13 }
  0x51   :  { %500 = vmatpush3.msra.mxu0 %v270_v28 }
  0xf1   :  { %v414_v29 = vpop.f32.mrf.mxu0 }
  0xf2   :  { %v449_v30 = vpop.f32.mrf.mxu1 }
  0xf3   :  { %v415_v32 = vpop.f32.mrf.mxu0 }
  0xf4   :  { %v450_v33 = vpop.f32.mrf.mxu1  ;;  %v416_v34 = vadd.f32 %v415_v32, %v414_v29 }
  0xf5   :  { %v451_v36 = vadd.f32 %v450_v33, %v449_v30 }
  0xf6   :  { %v196_v35 = vadd.f32 %v416_v34, %v380_v31 }
  0xf8   :  { %v266_v37 = vadd.f32 %v451_v36, %v196_v35 }
  0xfa   :  { %v269_v38 = vmax.f32 %v266_v37, 0.0 }
  0xfc   :  { %502 = vmatmul.mubr.f32.vlgmr.msra.gmra.mxu0 %v269_v38 }
 0x1bc   :  { %v359_v40 = vpop.f32.mrf.mxu0 }
 0x1bd   :  { %v360_v41 = vadd.f32 %v381_v39, %v359_v40 }
 0x1be   :  { %v503_v42 = vpop.f32.mrf.mxu0 }
 0x1bf   :  { %364 = vst.msk [vmem:[#allocation5] sm:$0x3] %vm363_vm1, %v360_v41 }
 0x1c0   :  { %543 = shalt.err (!%p540_p9)
}
 0x1c1   :  { %374 = dma.vmem_to_hbm [thread:$0]  %s372_s9, 32, %s661_s5, [#allocation4]  }
 0x1c2   :  { %554 = dma.done.wait [#allocation4], 32  }
 0x1c3   :  { %555 = vsyncadd [#allocation4], 4294967264 }
 0x1c4   :  { %378 = vsyncpa [#allocation3], 1 }
 0x1c5   :  { %379 = vsyncpa [#allocation4], 1 }

</bundles_post_ra>
